<compile_context>
chip_gen: v6e
topology: v6e:2x2x1
jax: 0.10.0
libtpu: 0.0.40
codegen_flags: <defaults>
</compile_context>

<pallas_src>
import jax
import jax.numpy as jnp
from jax.experimental import pallas as pl
from jax.experimental.pallas import tpu as pltpu


def match_kernel(x_ref, ravg_ref, wx_ref, wd_ref, b_ref, o_ref):
    wx = wx_ref[...]                                 # (Cout, C)  resident
    wd = wd_ref[...]                                 # (Cout, C)  resident
    b = b_ref[...]                                   # (Cout, 1)  resident
    nb = x_ref.shape[0]
    for n in range(nb):                              # small static unroll over batch block
        x = x_ref[n]                                 # (C, T)  T on lanes
        delta = jnp.abs(x - ravg_ref[n])             # (C, 1) broadcast -> (C, T)
        acc = jnp.dot(wx, x, preferred_element_type=jnp.float32)
        acc = acc + jnp.dot(wd, delta, preferred_element_type=jnp.float32)
        o_ref[n] = (acc + b).astype(o_ref.dtype)


def _cdiv(a, b):
    return (a + b - 1) // b


def _round_up(v, m):
    return _cdiv(v, m) * m


def _round_down(v, m):
    return (v // m) * m


def _choose_tiling(N, C, Cout, HW, *, dtype_bytes=4, target_bytes=4 << 20,
                   min_grid_steps=4, max_nb=8):
    """Pick (nb, t_hw, hw_pad): batch sub-block, lane tile, lane-padded HW."""
    hw_pad = _round_up(HW, 128)
    per_lane = dtype_bytes * (C + Cout)              # x-in + out bytes per lane column
    t_hw = max(128, _round_down(target_bytes // per_lane, 128))
    t_hw = min(t_hw, hw_pad)
    # Keep >= min_grid_steps total steps so both v7x TensorCores get work.
    while N * _cdiv(hw_pad, t_hw) < min_grid_steps and t_hw > 128:
        t_hw = max(128, _round_down(t_hw // 2, 128))
    # Snap the tile to a divisor of hw_pad (in 128-lane units) so every output
    # store is fully lane-dense (no masked final tile) — unless that would
    # shrink the tile by more than 2x.
    k = hw_pad // 128
    m = t_hw // 128
    d = next((d for d in range(m, 0, -1) if k % d == 0), 1)
    if 2 * d >= m:
        t_hw = d * 128
    hw_tiles = _cdiv(hw_pad, t_hw)
    # If one tile already spans the whole row, grow the block along N instead.
    nb = 1
    if hw_tiles == 1 and N > 1:
        per_image = per_lane * hw_pad
        nb = max(1, min(N, int(target_bytes // per_image)))
        nb = min(nb, max_nb)                                   # bound kernel unroll
        nb = min(nb, max(1, N // min(N, min_grid_steps)))      # keep grid steps
        while nb > 1 and N % nb != 0:                          # even batch blocks
            nb -= 1
    return nb, t_hw, hw_pad


def match_module_forward(x_nchw, ref_nchw, weight, bias):
    """x_nchw, ref_nchw: (N, C, H, W); weight: (Cout, 2C, 1, 1); bias: (Cout,)."""
    N, C, H, W = x_nchw.shape
    Cout = weight.shape[0]
    HW = H * W

    # Free reshape of NCHW — no transposes, HW sits on the 128-lane axis.
    x = x_nchw.reshape(N, C, HW)
    # AdaptiveAvgPool2d((1,1)) == global spatial mean, hoisted to plain JAX.
    ref_avg = jnp.mean(ref_nchw, axis=(2, 3)).reshape(N, C, 1)

    # Split the fused 1x1-conv weight: [x ; |x-avg|] concat becomes two dots.
    w = weight.reshape(Cout, 2 * C).astype(jnp.float32)
    w_x = w[:, :C]
    w_d = w[:, C:]
    b = bias.reshape(Cout, 1).astype(jnp.float32)

    nb, t_hw, hw_pad = _choose_tiling(N, C, Cout, HW)
    if hw_pad != HW:
        # Lane-pad HW so every block is 128-aligned; padded lanes are sliced off.
        x = jnp.pad(x, ((0, 0), (0, 0), (0, hw_pad - HW)))

    grid = (_cdiv(N, nb), _cdiv(hw_pad, t_hw))

    # Double-buffered in+out tiles plus resident small operands, with headroom.
    step_bytes = 4 * (nb * (C + Cout) * t_hw + nb * C + 2 * Cout * C + Cout)
    vmem_limit = int(min(96 << 20, max(32 << 20, 3 * step_bytes)))

    cost = pl.CostEstimate(
        flops=2 * N * HW * Cout * 2 * C,
        transcendentals=0,
        bytes_accessed=4 * (N * C * HW + N * Cout * HW + N * C + 2 * Cout * C + Cout),
    )

    out = pl.pallas_call(
        match_kernel,
        out_shape=jax.ShapeDtypeStruct((N, Cout, hw_pad), x_nchw.dtype),
        grid_spec=pltpu.PrefetchScalarGridSpec(
            num_scalar_prefetch=0,
            grid=grid,
            in_specs=[
                pl.BlockSpec((nb, C, t_hw), lambda n, t: (n, 0, t)),   # x tile
                pl.BlockSpec((nb, C, 1), lambda n, t: (n, 0, 0)),      # ref_avg
                pl.BlockSpec((Cout, C), lambda n, t: (0, 0)),          # w_x (resident)
                pl.BlockSpec((Cout, C), lambda n, t: (0, 0)),          # w_d (resident)
                pl.BlockSpec((Cout, 1), lambda n, t: (0, 0)),          # bias (resident)
            ],
            out_specs=pl.BlockSpec((nb, Cout, t_hw), lambda n, t: (n, 0, t)),
        ),
        compiler_params=pltpu.CompilerParams(
            dimension_semantics=("parallel", "parallel"),
            vmem_limit_bytes=vmem_limit),
        cost_estimate=cost,
    )(x, ref_avg, w_x, w_d, b)

    if hw_pad != HW:
        out = out[:, :, :HW]
    # Free reshape back to NCHW.
    return out.reshape(N, Cout, H, W)


def reference_forward(x, ref, weight, bias):
    """Plain-JAX reference replicating the PyTorch semantics (NCHW)."""
    ref_avg = jnp.mean(ref, axis=(2, 3), keepdims=True)        # (N, C, 1, 1)
    delta = jnp.abs(x - ref_avg)
    feat = jnp.concatenate([x, delta], axis=1)                  # (N, 2C, H, W)
    w = weight.reshape(weight.shape[0], weight.shape[1])        # (Cout, 2C)
    out = jnp.einsum('nchw,oc->nohw', feat, w) + bias[None, :, None, None]
    return out


if __name__ == "__main__":
    key = jax.random.PRNGKey(0)
    N, C, H, W = 2, 4, 16, 16
    in_channels = 2 * C        # metric_conv input = cat(x, delta) channels
    out_channels = 4

    k_x, k_r, k_w = jax.random.split(key, 3)
    x = jax.random.normal(k_x, (N, C, H, W), dtype=jnp.float32)
    ref = jax.random.normal(k_r, (N, C, H, W), dtype=jnp.float32)

    # xavier_init(distribution='uniform'): U(-a, a), a = sqrt(6/(fan_in+fan_out));
    # fan_in = in_channels*1*1, fan_out = out_channels*1*1; bias = 0.
    bound = (6.0 / (in_channels + out_channels)) ** 0.5
    weight = jax.random.uniform(k_w, (out_channels, in_channels, 1, 1),
                                minval=-bound, maxval=bound, dtype=jnp.float32)
    bias = jnp.zeros((out_channels,), dtype=jnp.float32)

    out = match_module_forward(x, ref, weight, bias)
    out = jax.block_until_ready(out)
    ref_out = reference_forward(x, ref, weight, bias)
    assert out.shape == (N, out_channels, H, W)
    assert jnp.allclose(out, ref_out, atol=1e-5, rtol=1e-5)

    # Second check: HW not a multiple of 128 exercises the lane-padding path.
    H2, W2 = 10, 13
    x2 = jax.random.normal(k_x, (N, C, H2, W2), dtype=jnp.float32)
    ref2 = jax.random.normal(k_r, (N, C, H2, W2), dtype=jnp.float32)
    out2 = jax.block_until_ready(match_module_forward(x2, ref2, weight, bias))
    ref_out2 = reference_forward(x2, ref2, weight, bias)
    assert out2.shape == (N, out_channels, H2, W2)
    assert jnp.allclose(out2, ref_out2, atol=1e-5, rtol=1e-5)

    print("KERNEL_OK")
</pallas_src>

<mosaic_0001>
module attributes {stable_mosaic.version = 11 : i64} {
  func.func @match_kernel(%arg0: i32, %arg1: i32, %arg2: memref<1x4x128xf32, #tpu.memory_space<vmem>>, %arg3: memref<1x4x1xf32, #tpu.memory_space<vmem>>, %arg4: memref<4x4xf32, #tpu.memory_space<vmem>>, %arg5: memref<4x4xf32, #tpu.memory_space<vmem>>, %arg6: memref<4x1xf32, #tpu.memory_space<vmem>>, %arg7: memref<1x4x128xf32, #tpu.memory_space<vmem>>) attributes {dimension_semantics = [#tpu.dimension_semantics<parallel>, #tpu.dimension_semantics<parallel>], iteration_bounds = array<i64: 2, 2>, scalar_prefetch = 0 : i64, scratch_operands = 0 : i64, tpu.core_type = #tpu.core_type<tc>, window_params = [{transform_indices = @transform_0, window_bounds = array<i64: 1, 4, 128>}, {transform_indices = @transform_1, window_bounds = array<i64: 1, 4, 1>}, {pipeline_mode = #tpu.pipeline_mode<synchronous>, transform_indices = @transform_2, window_bounds = array<i64: 4, 4>}, {pipeline_mode = #tpu.pipeline_mode<synchronous>, transform_indices = @transform_3, window_bounds = array<i64: 4, 4>}, {pipeline_mode = #tpu.pipeline_mode<synchronous>, transform_indices = @transform_4, window_bounds = array<i64: 4, 1>}, {transform_indices = @transform_5, window_bounds = array<i64: 1, 4, 128>}]} {
    %c0 = arith.constant 0 : index
    %c0_0 = arith.constant 0 : index
    %0 = vector.load %arg4[%c0, %c0_0] : memref<4x4xf32, #tpu.memory_space<vmem>>, vector<4x4xf32>
    %c0_1 = arith.constant 0 : index
    %c0_2 = arith.constant 0 : index
    %1 = vector.load %arg5[%c0_1, %c0_2] : memref<4x4xf32, #tpu.memory_space<vmem>>, vector<4x4xf32>
    %c0_3 = arith.constant 0 : index
    %c0_4 = arith.constant 0 : index
    %2 = vector.load %arg6[%c0_3, %c0_4] : memref<4x1xf32, #tpu.memory_space<vmem>>, vector<4x1xf32>
    %c0_5 = arith.constant 0 : index
    %c0_6 = arith.constant 0 : index
    %c0_7 = arith.constant 0 : index
    %3 = vector.load %arg2[%c0_5, %c0_6, %c0_7] : memref<1x4x128xf32, #tpu.memory_space<vmem>>, vector<1x4x128xf32>
    %4 = vector.shape_cast %3 : vector<1x4x128xf32> to vector<4x128xf32>
    %c0_8 = arith.constant 0 : index
    %c0_9 = arith.constant 0 : index
    %c0_10 = arith.constant 0 : index
    %5 = vector.load %arg3[%c0_8, %c0_9, %c0_10] : memref<1x4x1xf32, #tpu.memory_space<vmem>>, vector<1x4x1xf32>
    %6 = vector.shape_cast %5 : vector<1x4x1xf32> to vector<4x1xf32>
    %7 = vector.broadcast %6 : vector<4x1xf32> to vector<4x128xf32>
    %8 = arith.subf %4, %7 : vector<4x128xf32>
    %9 = math.absf %8 : vector<4x128xf32>
    %cst = arith.constant dense<0.000000e+00> : vector<4x128xf32>
    %10 = tpu.matmul %0, %4, %cst {dimension_numbers = #tpu.dot_dimension_numbers<[1], [0], [0], [1], [0, 0, 1, 1], [], []>} : vector<4x4xf32>, vector<4x128xf32>, vector<4x128xf32> -> vector<4x128xf32>
    %cst_11 = arith.constant dense<0.000000e+00> : vector<4x128xf32>
    %11 = tpu.matmul %1, %9, %cst_11 {dimension_numbers = #tpu.dot_dimension_numbers<[1], [0], [0], [1], [0, 0, 1, 1], [], []>} : vector<4x4xf32>, vector<4x128xf32>, vector<4x128xf32> -> vector<4x128xf32>
    %12 = arith.addf %10, %11 : vector<4x128xf32>
    %13 = vector.broadcast %2 : vector<4x1xf32> to vector<4x128xf32>
    %14 = arith.addf %12, %13 : vector<4x128xf32>
    %c0_12 = arith.constant 0 : index
    %c0_13 = arith.constant 0 : index
    %c0_14 = arith.constant 0 : index
    %15 = vector.load %arg7[%c0_12, %c0_13, %c0_14] : memref<1x4x128xf32, #tpu.memory_space<vmem>>, vector<1x4x128xf32>
    %16 = vector.shape_cast %15 : vector<1x4x128xf32> to vector<4x128xf32>
    %17 = vector.shape_cast %14 : vector<4x128xf32> to vector<1x4x128xf32>
    tpu.vector_store %arg7[%c0_12, %c0_13, %c0_14], %17 {strides = array<i32>} : memref<1x4x128xf32, #tpu.memory_space<vmem>>, vector<1x4x128xf32>,
    return
  }
  func.func @transform_0(%arg0: i32, %arg1: i32) -> (i32, i32, i32) {
    %c0_i32 = arith.constant 0 : i32
    %c0_i32_0 = arith.constant 0 : i32
    return %arg0, %c0_i32, %arg1 : i32, i32, i32
  }
  func.func @transform_1(%arg0: i32, %arg1: i32) -> (i32, i32, i32) {
    %c0_i32 = arith.constant 0 : i32
    %c0_i32_0 = arith.constant 0 : i32
    %c0_i32_1 = arith.constant 0 : i32
    return %arg0, %c0_i32, %c0_i32_0 : i32, i32, i32
  }
  func.func @transform_2(%arg0: i32, %arg1: i32) -> (i32, i32) {
    %c0_i32 = arith.constant 0 : i32
    %c0_i32_0 = arith.constant 0 : i32
    %c0_i32_1 = arith.constant 0 : i32
    return %c0_i32, %c0_i32_0 : i32, i32
  }
  func.func @transform_3(%arg0: i32, %arg1: i32) -> (i32, i32) {
    %c0_i32 = arith.constant 0 : i32
    %c0_i32_0 = arith.constant 0 : i32
    %c0_i32_1 = arith.constant 0 : i32
    return %c0_i32, %c0_i32_0 : i32, i32
  }
  func.func @transform_4(%arg0: i32, %arg1: i32) -> (i32, i32) {
    %c0_i32 = arith.constant 0 : i32
    %c0_i32_0 = arith.constant 0 : i32
    %c0_i32_1 = arith.constant 0 : i32
    return %c0_i32, %c0_i32_0 : i32, i32
  }
  func.func @transform_5(%arg0: i32, %arg1: i32) -> (i32, i32, i32) {
    %c0_i32 = arith.constant 0 : i32
    %c0_i32_0 = arith.constant 0 : i32
    return %arg0, %c0_i32, %arg1 : i32, i32, i32
  }
}

</mosaic_0001>

<bundles_post_ra>
// kernel: tpu_custom_call.1
= control target key start
LH: loop header
LB: loop body
LE: loop exit
PB: predicated region body
PF: predicated region fallthrough
CT: control target
= control target key end

     0   :  { %10 = vsyncpa [#allocation3], 0  ;;  %s1014_s0 = inlined_call_operand.hbm [shape: f32[2,4,256], index: 0, kind: input, shape index: {}]   ;;  %s1015_s1 = inlined_call_operand.vmem [shape: f32[2,4,1], index: 1, kind: input, shape index: {}]   ;;  %s1016_s2 = inlined_call_operand.vmem [shape: f32[4,4], index: 2, kind: input, shape index: {}]   ;;  %s1017_s3 = inlined_call_operand.vmem [shape: f32[4,4], index: 3, kind: input, shape index: {}]   ;;  %s1018_s4 = inlined_call_operand.vmem [shape: f32[4,1], index: 4, kind: input, shape index: {}]   ;;  %s1019_s5 = inlined_call_operand.hbm [shape: f32[2,4,256], index: 5, kind: output, shape index: {}]  }
   0x1   :  { %12 = vsyncpa [#allocation3 + $0x1], 0 }
   0x2   :  { %13 = vsyncpa [#allocation4], 0 }
   0x3   :  { %15 = vsyncpa [#allocation4 + $0x1], 0  ;;  %s838_s18 = smov 0   ;;  %s840_s19 = smov 0  }
   0x4   :  { %s842_s20 = smov 0   ;;  %s844_s21 = smov 0  }
   0x5   :  { %s846_s22 = smov 0   ;;  %s848_s23 = smov 0  }
   0x6   :  { %s850_s24 = smov 0   ;;  %s852_s25 = smov 0  }
   0x7 LB: > { %1023 = sst [smem:[#allocation8_spill]] %s773_s18  ;;  %s561_s26 = sadd.s32 4294967295, %s801_s25   ;;  %s801_s25 = sphi %s852_s25, %s21_s25   ;;  %s797_s24 = sphi %s850_s24, %s1041_s24   ;;  %s793_s23 = sphi %s848_s23, %s1040_s23   ;;  %s789_s22 = sphi %s846_s22, %s1039_s22   ;;  %s785_s21 = sphi %s844_s21, %s1038_s21   ;;  %s781_s20 = sphi %s842_s20, %s1037_s20   ;;  %s777_s19 = sphi %s840_s19, %s1036_s19   ;;  %s773_s18 = sphi %s838_s18, %s1035_s18  }
   0x8   : > { %s562_s27 = sadd.s32 4294967294, %s801_s25   ;;  %s30_s28 = sadd.s32 1, %s793_s23 }
   0x9   : > { %s33_s29 = sadd.s32 1, %s797_s24  ;;  %p31_p0 = scmp.ge.s32.totalorder %s30_s28, 2 }
   0xa   : > { %s42_s30 = sadd.s32 1, %s781_s20  ;;  %p49_p1 = scmp.ne.s32.totalorder %s781_s20, %s777_s19 }
   0xb   : > { %p50_p2 = scmp.eq.s32.totalorder %s801_s25, 0  ;;  %s1043_s28 = smov (%p31_p0, %s30_s28), 0 }
   0xc   : > { %1024 = sst [smem:[#allocation9_spill]] %s1043_s28  ;;  %s1045_s29 = smov (!%p31_p0, %s33_s29), %s797_s24 }
   0xd   : > { %s38_s6 = ssub.s32 %s793_s23, %s1043_s28  ;;  %p891_p3 = por %p50_p2, %p49_p1 }
   0xe   : > { %p35_p4 = scmp.ge.s32.totalorder %s1045_s29, 2  ;;  %p55_p5 = scmp.ne.s32.totalorder %s777_s19, %s773_s18 }
   0xf   : > { %p56_p6 = scmp.eq.s32.totalorder %s561_s26, 0  ;;  %p170_p7 = scmp.eq.s32.totalorder %s561_s26, 3 }
  0x10   : > { %s1047_s29 = smov (%p35_p4, %s1045_s29), 0  ;;  %p176_p10 = scmp.eq.s32.totalorder %s562_s27, 3 }
  0x11   : > { %1026 = sst [smem:[#allocation10_spill]] %s1047_s29  ;;  %p899_p8 = por %p56_p6, %p55_p5 }
  0x12   : > { %p903_p9 = por %p170_p7, %p49_p1  ;;  %s37_s10 = ssub.s32 %s797_s24, %s1047_s29 }
  0x13   : > { %s39_s11 = sor.u32 %s38_s6, %s37_s10  ;;  %p909_p12 = por %p176_p10, %p55_p5 }
  0x14   : > { %p40_p11 = scmp.eq.s32.totalorder %s39_s11, 0  ;;  %p607_p13 = scmp.lt.s32.totalorder %s801_s25, 4 }
  0x15   : > { %s1029_s12 = scalar_select %p909_p12, 1, 0 }
  0x16   : > { %s205_s13 = sand.u32 1, %s781_s20   ;;  %s566_s16 = sshll.u32 %s797_s24, 1 }
  0x17   : > { %s916_s14 = scalar_select %p40_p11, %s781_s20, %s42_s30  }
  0x18   : > { %s565_s15 = sshll.u32 %s205_s13, 2  ;;  %s214_s17 = sadd.s32 %s793_s23, %s566_s16 }
  0x19   : > { %s209_s26 = scalar_lea.vmem [#allocation2], %s565_s15  ;;  %s567_s29 = sshll.u32 %s214_s17, 6 }
  0x1a   : > { %s218_s28 = sshll.u32 %s209_s26, 4  ;;  %s216_s6 = scalar_lea.hbm %s1014_s0, %s567_s29  ;;  %s219_s28 = int_to_ptr.vmem [resolvable:$true] %s218_s28 }
  0x1b   : > { %p925_p0 = pnand %p607_p13, %p891_p3  ;;  %p568_p1 = scmp.ge.s32.totalorder %s801_s25, 1 }
  0x1c   : > { %p230_p2 = scmp.lt.s32.totalorder %s801_s25, 5  ;;  %s206_s30 = scalar_lea.sflag [#allocation3], %s205_s13 }
  0x1d   : > { %p679_p4 = pneg %p925_p0  ;;  %s690_s11 = scalar_lea.vmem %s219_s28, 64 }
  0x1e   : > { %p691_p5 = scmp.ne.s32.totalorder %s219_s28, %s690_s11  ;;  %s803_s15 = smov [#allocation2]  }
  0x1f   : > { %s695_s16 = sshll.u32 %s803_s15, 4  ;;  %s696_s16 = int_to_ptr.vmem [resolvable:$false] %s695_s16 }
  0x20   : > { %p693_p6 = pnand %p691_p5, %p679_p4  ;;  %s697_s18 = scalar_lea.vmem %s696_s16, 128 }
  0x21   : > { %p698_p10 = scmp.lt.s32.totalorder %s219_s28, %s696_s16  ;;  %p699_p11 = scmp.lt.s32.totalorder %s697_s18, %s690_s11 }
  0x22   : > { %p694_p7 = pneg %p693_p6 }
  0x23   : > { %p700_p3 = por %p699_p11, %p698_p10 }
  0x25   : > { %p701_p13 = pnand %p700_p3, %p694_p7 }
  0x27   : > { %704 = shalt.err (!%p701_p13)
}
  0x28   : > { %602 = dma.hbm_to_vmem [thread:$0]  (!%p925_p0), %s216_s6, 64, %s219_s28, %s206_s30  }
  0x29   : > { %p231_p12 = pnand %p568_p1, %p230_p2 }
  0x2a   : > { %s940_s29 = sand.u32 (!%p231_p12), 1, %s777_s19  }
  0x2b   : > { %234 = sbr.rel (%p231_p12) target bundleno = 395 (0x18b), region = 40  ;;  %s569_s7 = sshll.u32 (!%p231_p12), %s940_s29, 2 }
  0x2c   : > { %s237_s13 = scalar_lea.sflag (!%p231_p12), [#allocation3], %s940_s29  ;;  %s240_s17 = scalar_lea.vmem (!%p231_p12), [#allocation2], %s569_s7 }
  0x30   : > { %764 = dma.done.wait (%p899_p8), %s237_s13, 64  }
  0x31   : > { %766 = vsyncadd (%p899_p8), %s237_s13, 4294967232  ;;  %p271_p0 = scmp.lt.s32.totalorder %s789_s22, 1  ;;  %v804_v0 = vmov 0   ;;  %v805_v1 = vmov 0.0   ;;  %vm291_vm0 = vcmask 1043456   ;;  %vm806_vm1 = vmmov 0  }
  0x32   : > { %676 = vset.pattern.permute.xlu0 %v804_v0  ;;  %590 = vmatprep.subr.mxu1 %v805_v1  ;;  %vm287_vm2 = vcmask 31744   ;;  %v278_v3 = vld [vmem:[%s240_s17] sm:$0xf]  ;;  %s577_s13 = sshll.u32 %s789_s22, 1  ;;  %s449_s30 = scalar_lea.sflag [#allocation4], %s940_s29 }
  0x33   : > { %s272_s28 = scalar_select %p271_p0, %s789_s22, 1  ;;  %585 = vmatprep.subr.mxu0 %v805_v1  ;;  %592 = vmatprep.mubr.msk.f32.mxu1 %vm806_vm1, %v805_v1  ;;  %v275_v4 = vld [vmem:[%s1016_s2] sm:$0xf] }
  0x34   : > { %587 = vmatprep.mubr.msk.f32.mxu0 %vm806_vm1, %v805_v1  ;;  %591 = vmatpush3.msk.msra.mxu1 %vm291_vm0, %v278_v3  ;;  %v277_v5 = vld [vmem:[%s1018_s4] sm:$0xf]  ;;  %s460_s17 = sadd.s32 %s785_s21, %s577_s13  ;;  %s807_s21 = smov [#allocation5]  }
  0x35   : > { %s571_s26 = sshll.u32 %s272_s28, 2  ;;  %593 = vmatmul.mubr.msk.f32.vlgmr.msra.gmra.mxu1 %vm287_vm2, %v275_v4  ;;  %v276_v9 = vld [vmem:[%s1017_s3] sm:$0xf]  ;;  %s578_s28 = sshll.u32 %s460_s17, 6 }
  0x36   : > { %s274_s10 = scalar_lea.vmem %s1015_s1, %s571_s26  ;;  %s270_s26 = scalar_lea.vmem [#allocation5], %s569_s7 }
  0x37   : > { %v279_v2 = vld [vmem:[%s274_s10] sm:$0xf]  ;;  %s464_s27 = sshll.u32 %s270_s26, 4  ;;  %s462_s8 = scalar_lea.hbm %s1019_s5, %s578_s28  ;;  %s465_s27 = int_to_ptr.vmem [resolvable:$true] %s464_s27 }
  0x38   : > { %282 = vperm.xlu0 %676, %v279_v2   ;;  %s705_s11 = scalar_lea.vmem %s465_s27, 64  ;;  %s709_s22 = sshll.u32 %s807_s21, 4  ;;  %s710_s22 = int_to_ptr.vmem [resolvable:$false] %s709_s22 }
  0x39   : > { %p706_p8 = scmp.ne.s32.totalorder %s465_s27, %s705_s11  ;;  %s711_s7 = scalar_lea.vmem %s710_s22, 128 }
  0x3a   : > { %p712_p2 = scmp.lt.s32.totalorder %s465_s27, %s710_s22  ;;  %p713_p4 = scmp.lt.s32.totalorder %s711_s7, %s705_s11 }
  0x3b   : > { %p707_p12 = pnand %p706_p8, %p903_p9 }
  0x3c   : > { %443 = vperm.xlu0 %676, %v277_v5   ;;  %p714_p5 = por %p713_p4, %p712_p2 }
  0x3d   : > { %p708_p1 = pneg %p707_p12 }
  0x3f   : > { %p715_p6 = pnand %p714_p5, %p708_p1 }
  0xb3   : > { %v283_v6 = vpop.permute.xlu0 %282 }
  0xb4   : > { %v285_v7 = vsub.f32 %v278_v3, %v283_v6 }
  0xb6   : > { %v286_v8 = vand.u32 2147483647, %v285_v7 }
  0xb7   : > { %v444_v14 = vpop.permute.xlu0 %443 }
  0xb8   : > { %586 = vmatpush3.msk.msra.mxu0 %vm291_vm0, %v286_v8 }
  0xb9   : > { %588 = vmatmul.mubr.msk.f32.vlgmr.msra.gmra.mxu0 %vm287_vm2, %v276_v9 }
  0xf5   : > { %v437_v10 = vpop.f32.mrf.mxu1 }
  0xf7   : > { %v594_v11 = vpop.f32.mrf.mxu1 }
 0x179   : > { %v361_v12 = vpop.f32.mrf.mxu0 }
 0x17a   : > { %v438_v13 = vadd.f32 %v437_v10, %v361_v12 }
 0x17b   : > { %v589_v15 = vpop.f32.mrf.mxu0 }
 0x17c   : > { %v446_v16 = vadd.f32 %v444_v14, %v438_v13 }
 0x17e   : > { %447 = vst [vmem:[%s270_s26] sm:$0xf] %v446_v16 }
 0x17f   : > { %718 = shalt.err (!%p715_p6)
}
 0x180   : > { %s719_s15 = scalar_lea.hbm %s462_s8, 64  ;;  %s723_s18 = scalar_lea.hbm %s1019_s5, 256 }
 0x181   : > { %p720_p7 = scmp.ne.s32.totalorder %s462_s8, %s719_s15  ;;  %p724_p3 = scmp.lt.s32.totalorder %s462_s8, %s1019_s5 }
 0x182   : > { %p725_p13 = scmp.lt.s32.totalorder %s723_s18, %s719_s15 }
 0x183   : > { %p721_p10 = pnand %p720_p7, %p903_p9 }
 0x184   : > { %p726_p0 = por %p725_p13, %p724_p3 }
 0x185   : > { %p722_p11 = pneg %p721_p10 }
 0x187   : > { %p727_p8 = pnand %p726_p0, %p722_p11 }
 0x189   : > { %730 = shalt.err (!%p727_p8)
}
 0x18a   : > { %597 = dma.vmem_to_hbm [thread:$0]  (%p903_p9), %s465_s27, 64, %s462_s8, %s449_s30  }
 0x18b PF: > { %s1031_s28 = sld [smem:[#allocation8_spill]]  ;;  %p608_p12 = scmp.ge.s32.totalorder %s801_s25, 2 }
 0x18c   : > { %p1032_p1 = scmp.ne.s32.totalorder %s1029_s12, 0 }
 0x18e   : > { %p604_p2 = pnand %p608_p12, %p1032_p1 }
 0x190   : > { %p605_p4 = pneg %p604_p2 }
 0x191   : > { %s476_s26 = sand.u32 1, %s1031_s28  }
 0x192   : > { %s477_s6 = scalar_lea.sflag [#allocation4], %s476_s26 }
 0x193   : > { %768 = dma.done.wait (%p605_p4), %s477_s6, 64  }
 0x194   : > { %770 = vsyncadd (%p605_p4), %s477_s6, 4294967232  ;;  %s21_s25 = sadd.s32 1, %s801_s25   ;;  %s1033_s9 = sld [smem:[#allocation9_spill]] }
 0x195   : > { %p18_p5 = scmp.ge.s32.totalorder %s21_s25, 6   ;;  %s1034_s27 = sld [smem:[#allocation10_spill]] }
 0x196   : > { %s1035_s18 = smov %s777_s19  ;;  %s1036_s19 = smov %s781_s20 }
 0x197   : > { %s1037_s20 = smov %s916_s14  ;;  %s1038_s21 = smov %s793_s23 }
 0x198   : > { %s1039_s22 = smov %s797_s24  ;;  %20 = sbr.rel (!%p18_p5) target bundleno = 7 (0x7), region = 88 }
 0x19a   : > { %s1040_s23 = smov %s1033_s9 }
 0x19b   : > { %s1041_s24 = smov %s1034_s27 }
 0x19d   :  { %482 = vsyncpa [#allocation3], 1 }
 0x19e   :  { %484 = vsyncpa [#allocation3 + $0x1], 1 }
 0x19f   :  { %485 = vsyncpa [#allocation4], 1 }
 0x1a0   :  { %487 = vsyncpa [#allocation4 + $0x1], 1 }

</bundles_post_ra>
